<compile_context>
chip_gen: v7x
topology: tpu7x:2x2x1
jax: 0.10.0
libtpu: 0.0.40
codegen_flags: <defaults>
</compile_context>

<pallas_src>
import jax
import jax.numpy as jnp
from jax.experimental import pallas as pl
from jax.experimental.pallas import tpu as pltpu


def dann_disc_kernel(x_ref, w1_ref, b1_ref, w2_ref, b2_ref, w3_ref, b3_ref,
                     out_ref):
    # GradientReverseLayer is identity in the forward pass; Dropout is
    # eval-mode identity.
    # TODO(synk): gradient reversal (backward-only) and training-mode
    #             Dropout(0.5) PRNG masks are not implemented; this is the
    #             eval-mode forward pass only.
    x = x_ref[...].astype(jnp.bfloat16)                       # in-register cast

    # ad_layer1 + ReLU  (bf16 MXU, f32 accumulate)
    h = jnp.dot(x, w1_ref[...], preferred_element_type=jnp.float32) + b1_ref[...]
    h = jnp.maximum(h, 0.0)

    # ad_layer2 + ReLU
    h = jnp.dot(h.astype(jnp.bfloat16), w2_ref[...],
                preferred_element_type=jnp.float32) + b2_ref[...]
    h = jnp.maximum(h, 0.0)

    # ad_layer3: only the single real output column (XLU lane-reduce, f32),
    # then sigmoid with the reciprocal on the EUP slot.
    z = jnp.sum(h * w3_ref[...], axis=-1, keepdims=True) + b3_ref[...]   # (tb, 1)
    out_ref[...] = pl.reciprocal(1.0 + jnp.exp(-z), approx=True)


def dann_discriminator_forward(x, params, *, tb=256):
    """Fused DANNDiscriminator forward. x: (B, feature_dim). Returns (B, 1) f32."""
    w1, b1, w2, b2, w3, b3 = params
    B, F = x.shape
    H = w1.shape[1]

    # ---- batch tile selection (large tile, but keep >=2 grid steps) ----
    desired = max(8, (int(tb) // 8) * 8)
    tb_eff = min(desired, ((B + 7) // 8) * 8)            # no larger than padded batch
    if B >= 16:
        # prefer >=2 grid steps so v7x's two TensorCores both get work
        tb_eff = min(tb_eff, max(8, ((B // 2) // 8) * 8))
    Bp = pl.cdiv(B, tb_eff) * tb_eff

    # pad batch only if needed; no dtype cast here (cast happens in-kernel)
    x_p = x if Bp == B else jnp.pad(x, ((0, Bp - B), (0, 0)))

    # ---- parameter layout prep (tiny, one-time) ----
    w1_b = w1.astype(jnp.bfloat16)
    w2_b = w2.astype(jnp.bfloat16)
    w3_r = w3.reshape(1, H).astype(jnp.float32)          # (H,1) column -> (1,H) row
    b1_f = b1.reshape(1, H).astype(jnp.float32)
    b2_f = b2.reshape(1, H).astype(jnp.float32)
    b3_f = b3.reshape(1, 1).astype(jnp.float32)

    # ---- explicit VMEM budget: resident weights + double-buffered tiles + temps ----
    bytes_est = (
        2 * tb_eff * F * x.dtype.itemsize                # x tile (double-buffered)
        + 2 * tb_eff * 4                                 # out tile (double-buffered)
        + 2 * 2 * (F * H + H * H)                        # bf16 w1, w2 (x2 buffers)
        + 2 * 4 * (3 * H + 1)                            # f32 b1, b2, w3 row, b3
        + 2 * tb_eff * H * 4                             # f32 activation temps
    )
    vmem_limit = int(min(max(2 * bytes_est + (1 << 20), 32 << 20), 64 << 20))

    grid = (Bp // tb_eff,)
    const2 = lambda i: (0, 0)    # weights/biases: same block every step -> VMEM-resident

    out = pl.pallas_call(
        dann_disc_kernel,
        out_shape=jax.ShapeDtypeStruct((Bp, 1), jnp.float32),
        grid=grid,
        in_specs=[
            pl.BlockSpec((tb_eff, F), lambda i: (i, 0)),  # x batch tile (streamed)
            pl.BlockSpec((F, H), const2),                 # w1 (bf16, resident)
            pl.BlockSpec((1, H), const2),                 # b1
            pl.BlockSpec((H, H), const2),                 # w2 (bf16, resident)
            pl.BlockSpec((1, H), const2),                 # b2
            pl.BlockSpec((1, H), const2),                 # w3 row (f32)
            pl.BlockSpec((1, 1), const2),                 # b3
        ],
        out_specs=pl.BlockSpec((tb_eff, 1), lambda i: (i, 0)),
        compiler_params=pltpu.CompilerParams(
            dimension_semantics=("parallel",),            # v7x: split batch across TCs
            vmem_limit_bytes=vmem_limit),
    )(x_p, w1_b, b1_f, w2_b, b2_f, w3_r, b3_f)

    return out if Bp == B else out[:B]


def make_params(key, feature_dim, hidden_dim):
    """Deterministic init mirroring DANNDiscriminator.__init__ (weights as (in, out))."""
    k1, k2, k3 = jax.random.split(key, 3)
    w1 = (0.01 * jax.random.normal(k1, (feature_dim, hidden_dim))).astype(jnp.float32)
    w2 = (0.01 * jax.random.normal(k2, (hidden_dim, hidden_dim))).astype(jnp.float32)
    w3 = (0.30 * jax.random.normal(k3, (hidden_dim, 1))).astype(jnp.float32)
    b1 = jnp.zeros((1, hidden_dim), jnp.float32)
    b2 = jnp.zeros((1, hidden_dim), jnp.float32)
    b3 = jnp.zeros((1, 1), jnp.float32)
    return (w1, b1, w2, b2, w3, b3)


def reference_forward(x, params):
    """Pure-JAX reference using the same bf16-storage / f32-accumulate recipe."""
    w1, b1, w2, b2, w3, b3 = params
    xb = x.astype(jnp.bfloat16)
    h = jnp.maximum(
        jnp.dot(xb, w1.astype(jnp.bfloat16),
                preferred_element_type=jnp.float32) + b1, 0.0)
    h = jnp.maximum(
        jnp.dot(h.astype(jnp.bfloat16), w2.astype(jnp.bfloat16),
                preferred_element_type=jnp.float32) + b2, 0.0)
    z = jnp.dot(h, w3) + b3                      # final layer kept in f32 (as in kernel)
    return jax.nn.sigmoid(z)


if __name__ == "__main__":
    # Small shapes: (B, feature_dim) input as the forward implies; >=2 batch tiles.
    B, feature_dim, hidden_dim = 32, 64, 32

    key = jax.random.PRNGKey(0)
    kx, kp = jax.random.split(key)
    x = jax.random.normal(kx, (B, feature_dim), dtype=jnp.float32)
    params = make_params(kp, feature_dim, hidden_dim)

    out = dann_discriminator_forward(x, params)
    out = jax.block_until_ready(out)

    # correctness checks vs. pure-JAX reference
    ref = reference_forward(x, params)
    assert out.shape == (B, 1)
    assert bool(jnp.all((out > 0.0) & (out < 1.0)))
    assert jnp.allclose(out, ref, atol=2e-3, rtol=2e-3), \
        float(jnp.max(jnp.abs(out - ref)))

    print("KERNEL_OK")
</pallas_src>

<mosaic_0001>
module attributes {stable_mosaic.version = 11 : i64} {
  func.func @dann_disc_kernel(%arg0: i32, %arg1: memref<16x64xf32, #tpu.memory_space<vmem>>, %arg2: memref<64x32xbf16, #tpu.memory_space<vmem>>, %arg3: memref<1x32xf32, #tpu.memory_space<vmem>>, %arg4: memref<32x32xbf16, #tpu.memory_space<vmem>>, %arg5: memref<1x32xf32, #tpu.memory_space<vmem>>, %arg6: memref<1x32xf32, #tpu.memory_space<vmem>>, %arg7: memref<1x1xf32, #tpu.memory_space<vmem>>, %arg8: memref<16x1xf32, #tpu.memory_space<vmem>>) attributes {dimension_semantics = [#tpu.dimension_semantics<parallel>], iteration_bounds = array<i64: 2>, scalar_prefetch = 0 : i64, scratch_operands = 0 : i64, tpu.core_type = #tpu.core_type<tc>, window_params = [{transform_indices = @transform_0, window_bounds = array<i64: 16, 64>}, {pipeline_mode = #tpu.pipeline_mode<synchronous>, transform_indices = @transform_1, window_bounds = array<i64: 64, 32>}, {pipeline_mode = #tpu.pipeline_mode<synchronous>, transform_indices = @transform_2, window_bounds = array<i64: 1, 32>}, {pipeline_mode = #tpu.pipeline_mode<synchronous>, transform_indices = @transform_3, window_bounds = array<i64: 32, 32>}, {pipeline_mode = #tpu.pipeline_mode<synchronous>, transform_indices = @transform_4, window_bounds = array<i64: 1, 32>}, {pipeline_mode = #tpu.pipeline_mode<synchronous>, transform_indices = @transform_5, window_bounds = array<i64: 1, 32>}, {pipeline_mode = #tpu.pipeline_mode<synchronous>, transform_indices = @transform_6, window_bounds = array<i64: 1, 1>}, {transform_indices = @transform_7, window_bounds = array<i64: 16, 1>}]} {
    %c0 = arith.constant 0 : index
    %c0_0 = arith.constant 0 : index
    %0 = vector.load %arg1[%c0, %c0_0] : memref<16x64xf32, #tpu.memory_space<vmem>>, vector<16x64xf32>
    %1 = arith.truncf %0 : vector<16x64xf32> to vector<16x64xbf16>
    %c0_1 = arith.constant 0 : index
    %c0_2 = arith.constant 0 : index
    %2 = vector.load %arg2[%c0_1, %c0_2] : memref<64x32xbf16, #tpu.memory_space<vmem>>, vector<64x32xbf16>
    %cst = arith.constant dense<0.000000e+00> : vector<16x32xf32>
    %3 = tpu.matmul %1, %2, %cst {dimension_numbers = #tpu.dot_dimension_numbers<[1], [0], [0], [1], [0, 0, 1, 1], [], []>} : vector<16x64xbf16>, vector<64x32xbf16>, vector<16x32xf32> -> vector<16x32xf32>
    %c0_3 = arith.constant 0 : index
    %c0_4 = arith.constant 0 : index
    %4 = vector.load %arg3[%c0_3, %c0_4] : memref<1x32xf32, #tpu.memory_space<vmem>>, vector<1x32xf32>
    %5 = vector.broadcast %4 : vector<1x32xf32> to vector<16x32xf32>
    %6 = arith.addf %3, %5 : vector<16x32xf32>
    %cst_5 = arith.constant 0.000000e+00 : f32
    %7 = vector.broadcast %cst_5 : f32 to vector<16x32xf32>
    %8 = arith.maximumf %6, %7 : vector<16x32xf32>
    %9 = arith.truncf %8 : vector<16x32xf32> to vector<16x32xbf16>
    %c0_6 = arith.constant 0 : index
    %c0_7 = arith.constant 0 : index
    %10 = vector.load %arg4[%c0_6, %c0_7] : memref<32x32xbf16, #tpu.memory_space<vmem>>, vector<32x32xbf16>
    %cst_8 = arith.constant dense<0.000000e+00> : vector<16x32xf32>
    %11 = tpu.matmul %9, %10, %cst_8 {dimension_numbers = #tpu.dot_dimension_numbers<[1], [0], [0], [1], [0, 0, 1, 1], [], []>} : vector<16x32xbf16>, vector<32x32xbf16>, vector<16x32xf32> -> vector<16x32xf32>
    %c0_9 = arith.constant 0 : index
    %c0_10 = arith.constant 0 : index
    %12 = vector.load %arg5[%c0_9, %c0_10] : memref<1x32xf32, #tpu.memory_space<vmem>>, vector<1x32xf32>
    %13 = vector.broadcast %12 : vector<1x32xf32> to vector<16x32xf32>
    %14 = arith.addf %11, %13 : vector<16x32xf32>
    %cst_11 = arith.constant 0.000000e+00 : f32
    %15 = vector.broadcast %cst_11 : f32 to vector<16x32xf32>
    %16 = arith.maximumf %14, %15 : vector<16x32xf32>
    %c0_12 = arith.constant 0 : index
    %c0_13 = arith.constant 0 : index
    %17 = vector.load %arg6[%c0_12, %c0_13] : memref<1x32xf32, #tpu.memory_space<vmem>>, vector<1x32xf32>
    %18 = vector.broadcast %17 : vector<1x32xf32> to vector<16x32xf32>
    %19 = arith.mulf %16, %18 : vector<16x32xf32>
    %cst_14 = arith.constant dense<0.000000e+00> : vector<16xf32>
    %20 = vector.multi_reduction <add>, %19, %cst_14 [1] : vector<16x32xf32> to vector<16xf32>
    %21 = vector.shape_cast %20 : vector<16xf32> to vector<16x1xf32>
    %c0_15 = arith.constant 0 : index
    %c0_16 = arith.constant 0 : index
    %22 = vector.load %arg7[%c0_15, %c0_16] : memref<1x1xf32, #tpu.memory_space<vmem>>, vector<1x1xf32>
    %23 = vector.broadcast %22 : vector<1x1xf32> to vector<16x1xf32>
    %24 = arith.addf %21, %23 : vector<16x1xf32>
    %cst_17 = arith.constant 0.000000e+00 : f32
    %25 = vector.broadcast %cst_17 : f32 to vector<16x1xf32>
    %26 = arith.subf %25, %24 : vector<16x1xf32>
    %27 = math.exp %26 : vector<16x1xf32>
    %cst_18 = arith.constant 1.000000e+00 : f32
    %28 = vector.broadcast %cst_18 : f32 to vector<16x1xf32>
    %29 = arith.addf %28, %27 : vector<16x1xf32>
    %30 = tpu.reciprocal %29 {approx = true} : vector<16x1xf32> -> vector<16x1xf32>
    %c0_19 = arith.constant 0 : index
    %c0_20 = arith.constant 0 : index
    %31 = vector.load %arg8[%c0_19, %c0_20] : memref<16x1xf32, #tpu.memory_space<vmem>>, vector<16x1xf32>
    tpu.vector_store %arg8[%c0_19, %c0_20], %30 {strides = array<i32>} : memref<16x1xf32, #tpu.memory_space<vmem>>, vector<16x1xf32>,
    return
  }
  func.func @transform_0(%arg0: i32) -> (i32, i32) {
    %c0_i32 = arith.constant 0 : i32
    %c0_i32_0 = arith.constant 0 : i32
    return %arg0, %c0_i32 : i32, i32
  }
  func.func @transform_1(%arg0: i32) -> (i32, i32) {
    %c0_i32 = arith.constant 0 : i32
    %c0_i32_0 = arith.constant 0 : i32
    %c0_i32_1 = arith.constant 0 : i32
    return %c0_i32, %c0_i32_0 : i32, i32
  }
  func.func @transform_2(%arg0: i32) -> (i32, i32) {
    %c0_i32 = arith.constant 0 : i32
    %c0_i32_0 = arith.constant 0 : i32
    %c0_i32_1 = arith.constant 0 : i32
    return %c0_i32, %c0_i32_0 : i32, i32
  }
  func.func @transform_3(%arg0: i32) -> (i32, i32) {
    %c0_i32 = arith.constant 0 : i32
    %c0_i32_0 = arith.constant 0 : i32
    %c0_i32_1 = arith.constant 0 : i32
    return %c0_i32, %c0_i32_0 : i32, i32
  }
  func.func @transform_4(%arg0: i32) -> (i32, i32) {
    %c0_i32 = arith.constant 0 : i32
    %c0_i32_0 = arith.constant 0 : i32
    %c0_i32_1 = arith.constant 0 : i32
    return %c0_i32, %c0_i32_0 : i32, i32
  }
  func.func @transform_5(%arg0: i32) -> (i32, i32) {
    %c0_i32 = arith.constant 0 : i32
    %c0_i32_0 = arith.constant 0 : i32
    %c0_i32_1 = arith.constant 0 : i32
    return %c0_i32, %c0_i32_0 : i32, i32
  }
  func.func @transform_6(%arg0: i32) -> (i32, i32) {
    %c0_i32 = arith.constant 0 : i32
    %c0_i32_0 = arith.constant 0 : i32
    %c0_i32_1 = arith.constant 0 : i32
    return %c0_i32, %c0_i32_0 : i32, i32
  }
  func.func @transform_7(%arg0: i32) -> (i32, i32) {
    %c0_i32 = arith.constant 0 : i32
    %c0_i32_0 = arith.constant 0 : i32
    return %arg0, %c0_i32 : i32, i32
  }
}

</mosaic_0001>

<bundles_post_ra>
// kernel: tpu_custom_call.1
= control target key start
LH: loop header
LB: loop body
LE: loop exit
PB: predicated region body
PF: predicated region fallthrough
CT: control target
= control target key end

     0   :  { %s666_s26 = smov 0   ;;  %s720_s0 = inlined_call_operand.vmem [shape: f32[32,64], index: 0, kind: input, shape index: {}]   ;;  %s721_s1 = inlined_call_operand.vmem [shape: bf16[64,32], index: 1, kind: input, shape index: {}]   ;;  %s722_s2 = inlined_call_operand.vmem [shape: f32[1,32], index: 2, kind: input, shape index: {}]   ;;  %s723_s3 = inlined_call_operand.vmem [shape: bf16[32,32], index: 3, kind: input, shape index: {}]   ;;  %s724_s4 = inlined_call_operand.vmem [shape: f32[1,32], index: 4, kind: input, shape index: {}]   ;;  %s725_s5 = inlined_call_operand.vmem [shape: f32[1,32], index: 5, kind: input, shape index: {}]   ;;  %s726_s6 = inlined_call_operand.<no memory space> [shape: f32[1,1], index: 6, kind: input, shape index: {}]   ;;  %s727_s7 = inlined_call_operand.vmem [shape: f32[32,1], index: 7, kind: output, shape index: {}]  }
   0x1   :  { %v12_v0 = vstv %s726_s6 }
   0x2   :  { %13 = vst [vmem:[#allocation2] sm:$0x1] %v12_v0 }
   0x3 LB: > { %s538_s27 = sadd.s32 4294967295, %s619_s26   ;;  %p542_p0 = scmp.ge.s32.totalorder %s619_s26, 1  ;;  %s619_s26 = sphi %s666_s26, %s19_s26  }
   0x4   : > { %p240_p1 = scmp.lt.s32.totalorder %s619_s26, 3 }
   0x6   : > { %p241_p2 = pnand %p542_p0, %p240_p1 }
   0x7   : > { %v599_v1 = vld [vmem:[%s721_s1] sm:$0xff] (!%p241_p2)   ;;  %v621_v2 = vmov (!%p241_p2), 0.0   ;;  %v600_v3 = vld [vmem:[%s721_s1 + $0x8] sm:$0xff] (!%p241_p2)   ;;  %vm622_vm0 = vmmov (!%p241_p2), 0   ;;  %s543_s8 = sshll.u32 (!%p241_p2), %s538_s27, 1  ;;  %v601_v4 = vld [vmem:[%s721_s1 + $0x10] sm:$0xff] (!%p241_p2)  }
   0x8   : > { %244 = sbr.rel (%p241_p2) target bundleno = 640 (0x280), region = 48  ;;  %569 = vmatprep.subr.bf16.mxu0 (!%p241_p2), %v621_v2  ;;  %581 = vmatprep.subr.bf16.mxu1 (!%p241_p2), %v621_v2  ;;  %p273_p3 = scmp.lt.s32.totalorder (!%p241_p2), %s543_s8, 3  ;;  %v602_v5 = vld [vmem:[%s721_s1 + $0x18] sm:$0xff] (!%p241_p2)   ;;  %vm327_vm1 = vcmask (!%p241_p2), 523264   ;;  %v603_v9 = vld [vmem:[%s723_s3] sm:$0xff] (!%p241_p2)   ;;  %v604_v10 = vld [vmem:[%s723_s3 + $0x8] sm:$0xff] (!%p241_p2)  }
   0x9   : > { %570 = vmatpush3.bf16.msra.mxu0 (!%p241_p2), %v599_v1  ;;  %577 = vmatprep.mubr.msk.bf16.mxu0 (!%p241_p2), %vm622_vm0, %v621_v2  ;;  %v547_v11 = vld [vmem:[%s722_s2] ss:$0 sm:$0xff] (!%p241_p2)  ;;  %vm398_vm2 = vcmask (!%p241_p2), 261120   ;;  %vm479_vm3 = vcmask (!%p241_p2), 7168  }
   0xa   : > { %571 = vmatprep.subr.bf16.mxu0 (!%p241_p2), %v621_v2  ;;  %585 = vmatprep.mubr.msk.bf16.mxu1 (!%p241_p2), %vm622_vm0, %v621_v2  ;;  %v553_v21 = vld [vmem:[%s724_s4] ss:$0 sm:$0xff] (!%p241_p2) }
   0xb   : > { %582 = vmatpush3.bf16.msra.mxu1 (!%p241_p2), %v603_v9  ;;  %v557_v26 = vld [vmem:[%s725_s5] ss:$0 sm:$0xff] (!%p241_p2) }
   0xc   : > { %583 = vmatprep.subr.bf16.mxu1 (!%p241_p2), %v621_v2  ;;  %v558_v35 = vld [vmem:[#allocation2] ss:$0 sm:$0xff] (!%p241_p2) }
   0xd   : > { %572 = vmatpush3.bf16.msra.mxu0 (!%p241_p2), %v600_v3 }
   0xe   : > { %573 = vmatprep.subr.bf16.mxu0 (!%p241_p2), %v621_v2 }
   0xf   : > { %s729_s8 = smov (!%p273_p3, %s543_s8), 3  ;;  %584 = vmatpush3.bf16.msra.mxu1 %v604_v10 }
  0x10   : > { %s544_s11 = sshll.u32 %s729_s8, 3 }
  0x11   : > { %s276_s14 = scalar_lea.vmem %s720_s0, %s544_s11  ;;  %574 = vmatpush3.bf16.msra.mxu0 %v601_v4  ;;  %s282_s6 = scalar_lea.vmem %s727_s7, %s544_s11 }
  0x12   : > { %v285_v6 = vld [vmem:[%s276_s14] sm:$0xff]  ;;  %v286_v7 = vld [vmem:[%s276_s14 + $0x8] sm:$0xff]  ;;  %575 = vmatprep.subr.bf16.mxu0 %v621_v2 }
  0x13   : > { %v287_v8 = vpack.c.bf16 %v286_v7, %v285_v6 }
  0x15   : > { %576 = vmatpush3.bf16.msra.mxu0 %v602_v5 }
  0x18   : > { %578 = vmatmul.mubr.msk.bf16.vlgmr.msra.gmra.mrb[0].mxu0 %vm327_vm1, %v287_v8 }
  0xeb   : > { %v365_v12 = vpop.f32.mrb[0].mxu0 }
  0xec   : > { %v366_v13 = vadd.f32 %v547_v11, %v365_v12  ;;  %v579_v14 = vpop.f32.mrb[1].mxu0 }
  0xed   : > { %v368_v15 = vpop.f32.mrb[2].mxu0 }
  0xee   : > { %v369_v16 = vadd.f32 %v547_v11, %v368_v15  ;;  %v580_v17 = vpop.f32.mrb[3].mxu0  ;;  %v372_v18 = vmax.f32 %v366_v13, 0.0 }
  0xf0   : > { %v373_v19 = vmax.f32 %v369_v16, 0.0 }
  0xf2   : > { %v374_v20 = vpack.c.bf16 %v373_v19, %v372_v18 }
  0xf4   : > { %586 = vmatmul.mubr.msk.bf16.vlgmr.msra.gmra.mrb[0].mxu1 %vm398_vm2, %v374_v20 }
 0x1c7   : > { %v436_v22 = vpop.f32.mrb[0].mxu1 }
 0x1c8   : > { %v437_v23 = vadd.f32 %v553_v21, %v436_v22  ;;  %v587_v24 = vpop.f32.mrb[1].mxu1 }
 0x1c9   : > { %v439_v25 = vpop.f32.mrb[2].mxu1 }
 0x1ca   : > { %v443_v27 = vmax.f32 %v437_v23, 0.0  ;;  %v440_v28 = vadd.f32 %v553_v21, %v439_v25  ;;  %v588_v29 = vpop.f32.mrb[3].mxu1 }
 0x1cc   : > { %v444_v30 = vmax.f32 %v440_v28, 0.0  ;;  %v452_v31 = vmul.f32 %v557_v26, %v443_v27 }
 0x1ce   : > { %v454_v32 = vsel %vm398_vm2, %v452_v31, 0.0  ;;  %v453_v33 = vmul.f32 %v557_v26, %v444_v30 }
 0x1cf   : > { %455 = vadd.xlane.f32.xlu0 %v454_v32 }
 0x1d0   : > { %v457_v34 = vsel %vm398_vm2, %v453_v33, 0.0 }
 0x1d3   : > { %458 = vadd.xlane.f32.xlu0 %v457_v34 }
 0x25c   : > { %v456_v36 = vpop.xlane.xlu0 %455 }
 0x25d   : > { %v467_v37 = vadd.f32 %v558_v35, %v456_v36 }
 0x25f   : > { %v469_v38 = vsub.f32 0.0, %v467_v37 }
 0x260   : > { %v459_v39 = vpop.xlane.xlu0 %458 }
 0x261   : > { %v471_v40 = vmul.f32 1.442695, %v469_v38  ;;  %v468_v41 = vadd.f32 %v558_v35, %v459_v39 }
 0x263   : > { %605 = vpow2.f32 %v471_v40  ;;  %v470_v42 = vsub.f32 0.0, %v468_v41 }
 0x265   : > { %v473_v43 = vmul.f32 1.442695, %v470_v42 }
 0x267   : > { %607 = vpow2.f32 %v473_v43 }
 0x26d   : > { %v606_v44 = vpop.eup %605 }
 0x26e   : > { %v475_v45 = vadd.f32 1.0, %v606_v44 }
 0x270   : > { %609 = vrcp.f32 %v475_v45 }
 0x271   : > { %v608_v46 = vpop.eup %607 }
 0x272   : > { %v476_v47 = vadd.f32 1.0, %v608_v46 }
 0x274   : > { %611 = vrcp.f32 %v476_v47 }
 0x27a   : > { %v610_v48 = vpop.eup %609 }
 0x27b   : > { %480 = vst.msk [vmem:[%s282_s6] sm:$0xff] %vm479_vm3, %v610_v48 }
 0x27e   : > { %v612_v49 = vpop.eup %611 }
 0x27f   : > { %481 = vst.msk [vmem:[%s282_s6 + $0x8] sm:$0xff] %vm479_vm3, %v612_v49 }
 0x280 PF: > { %s19_s26 = sadd.s32 1, %s619_s26  }
 0x281   : > { %p16_p4 = scmp.ge.s32.totalorder %s19_s26, 4  }
 0x283   :  { %18 = sbr.rel (!%p16_p4) target bundleno = 3 (0x3), region = 78 }

</bundles_post_ra>
